<compile_context>
chip_gen: v5e
topology: v5e:2x2
jax: 0.10.0
libtpu: 0.0.40
codegen_flags: <defaults>
</compile_context>

<pallas_src>
import jax
import jax.numpy as jnp
from jax.experimental import pallas as pl
from jax.experimental.pallas import tpu as pltpu


def h_swish_kernel(x_ref, o_ref):
    # x * relu6(x + 3) / 6, computed in f32, stored in the output dtype.
    x = x_ref[...].astype(jnp.float32)
    o_ref[...] = (x * (jnp.clip(x + 3.0, 0.0, 6.0) / 6.0)).astype(o_ref.dtype)


def _sublane_multiple(dtype):
    """Minimum second-to-last block-dim multiple for this dtype's packing."""
    bits = jnp.dtype(dtype).itemsize * 8
    if bits >= 32:
        return 8
    if bits == 16:
        return 16
    return 32


def h_swish(x, *, target_tile_bytes=2 * 1024 * 1024, min_grid_steps=4):
    """Apply h_swish elementwise to an array of any shape/dtype."""
    orig_shape = x.shape
    dtype = x.dtype
    total = x.size
    if total == 0:
        return x
    itemsize = jnp.dtype(dtype).itemsize
    sub = _sublane_multiple(dtype)

    # Lane width: largest multiple of 128 (capped at 1024) that divides the
    # element count, so the flat-length pad (an extra HBM pass) rarely fires.
    lanes = 128
    for cand in (1024, 896, 768, 640, 512, 384, 256, 128):
        if total % cand == 0:
            lanes = cand
            break

    flat = x.reshape(-1)
    padded_len = pl.cdiv(total, lanes) * lanes
    needs_pad = padded_len != total
    if needs_pad:  # only when even 128 does not divide the element count
        flat = jnp.pad(flat, (0, padded_len - total))
    rows = padded_len // lanes
    x2 = flat.reshape(rows, lanes)

    slab_bytes = rows * lanes * itemsize
    if slab_bytes <= 256 * 1024:
        # Overhead-dominated input: one full-extent block (block dim == full
        # dim, so no sublane-multiple requirement), grid of 1.
        block_rows = rows
    else:
        # ~target_tile_bytes per tile, rounded down to the sublane multiple.
        block_rows = max(sub, (target_tile_bytes // (lanes * itemsize)) // sub * sub)
        # Keep at least `min_grid_steps` pipeline stages when possible so the
        # software pipeline can overlap DMA-in / compute / DMA-out.
        cap = (rows // min_grid_steps) // sub * sub
        if cap >= sub:
            block_rows = min(block_rows, cap)

    grid = (pl.cdiv(rows, block_rows),)

    out2 = pl.pallas_call(
        h_swish_kernel,
        out_shape=jax.ShapeDtypeStruct((rows, lanes), dtype),
        grid=grid,
        in_specs=[pl.BlockSpec((block_rows, lanes), lambda i: (i, 0))],
        out_specs=pl.BlockSpec((block_rows, lanes), lambda i: (i, 0)),
        compiler_params=pltpu.CompilerParams(
            # Grid steps are independent.  (On v7x, pltpu.CORE_PARALLEL on this
            # axis would split DMA across both TensorCores; "parallel" is kept
            # for portability across v5e/v6e/v7x.)
            dimension_semantics=("parallel",),
        ),
        cost_estimate=pl.CostEstimate(
            flops=4 * total,
            transcendentals=0,
            bytes_accessed=2 * total * itemsize,
        ),
    )(x2)

    if needs_pad:
        return out2.reshape(-1)[:total].reshape(orig_shape)
    return out2.reshape(orig_shape)


def h_swish_reference(x):
    """Plain-JAX reference mirroring the PyTorch forward."""
    xf = x.astype(jnp.float32)
    return (xf * (jnp.clip(xf + 3.0, 0.0, 6.0) / 6.0)).astype(x.dtype)


if __name__ == "__main__":
    key = jax.random.PRNGKey(0)

    # Small NCHW shape consistent with how h_swish is used inside CoordAtt.
    N, C, H, W = 2, 4, 16, 16
    x = jax.random.normal(key, (N, C, H, W), jnp.float32) * 3.0
    out = jax.block_until_ready(h_swish(x))
    ref = h_swish_reference(x)
    assert out.shape == (N, C, H, W)
    assert out.dtype == x.dtype
    assert jnp.allclose(out, ref, atol=1e-6, rtol=1e-6), "f32 mismatch vs reference"

    # bf16 input exercises the dtype-generic (16-sublane) path.
    xb = x.astype(jnp.bfloat16)
    outb = jax.block_until_ready(h_swish(xb))
    refb = h_swish_reference(xb)
    assert outb.dtype == jnp.bfloat16
    assert jnp.allclose(outb.astype(jnp.float32), refb.astype(jnp.float32),
                        atol=1e-2, rtol=1e-2), "bf16 mismatch vs reference"

    # Larger input exercises the multi-step pipelined grid with a masked
    # trailing partial block (no row padding).
    x_big = jax.random.normal(jax.random.PRNGKey(1), (4, 32, 28, 28), jnp.float32) * 3.0
    out_big = jax.block_until_ready(h_swish(x_big))
    assert jnp.allclose(out_big, h_swish_reference(x_big), atol=1e-6, rtol=1e-6), \
        "large-input mismatch vs reference"

    # Awkward size exercises the flat-length pad + final-slice fallback path.
    x_odd = jax.random.normal(jax.random.PRNGKey(2), (3, 5, 7, 11), jnp.float32) * 3.0
    out_odd = jax.block_until_ready(h_swish(x_odd))
    assert jnp.allclose(out_odd, h_swish_reference(x_odd), atol=1e-6, rtol=1e-6), \
        "odd-size mismatch vs reference"

    print("KERNEL_OK")
</pallas_src>

<mosaic_0001>
module attributes {stable_mosaic.version = 11 : i64} {
  func.func @h_swish_kernel(%arg0: i32, %arg1: memref<2x1024xf32, #tpu.memory_space<vmem>>, %arg2: memref<2x1024xf32, #tpu.memory_space<vmem>>) attributes {dimension_semantics = [#tpu.dimension_semantics<parallel>], iteration_bounds = array<i64: 1>, scalar_prefetch = 0 : i64, scratch_operands = 0 : i64, tpu.core_type = #tpu.core_type<tc>, window_params = [{transform_indices = @transform_0, window_bounds = array<i64: 2, 1024>}, {transform_indices = @transform_1, window_bounds = array<i64: 2, 1024>}]} {
    %c0 = arith.constant 0 : index
    %c0_0 = arith.constant 0 : index
    %0 = vector.load %arg1[%c0, %c0_0] : memref<2x1024xf32, #tpu.memory_space<vmem>>, vector<2x1024xf32>
    %cst = arith.constant 3.000000e+00 : f32
    %1 = vector.broadcast %cst : f32 to vector<2x1024xf32>
    %2 = arith.addf %0, %1 : vector<2x1024xf32>
    %cst_1 = arith.constant 0.000000e+00 : f32
    %cst_2 = arith.constant 6.000000e+00 : f32
    %3 = vector.broadcast %cst_1 : f32 to vector<2x1024xf32>
    %4 = arith.maximumf %3, %2 : vector<2x1024xf32>
    %5 = vector.broadcast %cst_2 : f32 to vector<2x1024xf32>
    %6 = arith.minimumf %5, %4 : vector<2x1024xf32>
    %cst_3 = arith.constant 6.000000e+00 : f32
    %7 = vector.broadcast %cst_3 : f32 to vector<2x1024xf32>
    %8 = arith.divf %6, %7 : vector<2x1024xf32>
    %9 = arith.mulf %0, %8 : vector<2x1024xf32>
    %c0_4 = arith.constant 0 : index
    %c0_5 = arith.constant 0 : index
    %10 = vector.load %arg2[%c0_4, %c0_5] : memref<2x1024xf32, #tpu.memory_space<vmem>>, vector<2x1024xf32>
    tpu.vector_store %arg2[%c0_4, %c0_5], %9 {strides = array<i32>} : memref<2x1024xf32, #tpu.memory_space<vmem>>, vector<2x1024xf32>,
    return
  }
  func.func @transform_0(%arg0: i32) -> (i32, i32) {
    %c0_i32 = arith.constant 0 : i32
    %c0_i32_0 = arith.constant 0 : i32
    return %arg0, %c0_i32 : i32, i32
  }
  func.func @transform_1(%arg0: i32) -> (i32, i32) {
    %c0_i32 = arith.constant 0 : i32
    %c0_i32_0 = arith.constant 0 : i32
    return %arg0, %c0_i32 : i32, i32
  }
}

</mosaic_0001>

<bundles_post_ra>
// kernel: tpu_custom_call.1
= control target key start
LH: loop header
LB: loop body
LE: loop exit
PB: predicated region body
PF: predicated region fallthrough
CT: control target
= control target key end

     0   :  { %6 = vsyncpa [#allocation3], 0  ;;  %s137_s0 = inlined_call_operand.hbm [shape: f32[2,1024], index: 0, kind: input, shape index: {}]   ;;  %s138_s1 = inlined_call_operand.hbm [shape: f32[2,1024], index: 1, kind: output, shape index: {}]  }
   0x1   :  { %7 = vsyncpa [#allocation4], 0  ;;  %s13_s8 = sshll.u32 %s137_s0, 4  ;;  %s118_s9 = smov [#allocation2]   ;;  %s14_s8 = int_to_ptr.hbm [resolvable:$true] %s13_s8 }
   0x2   :  { %s15_s10 = sshll.u32 %s118_s9, 4  ;;  %s16_s10 = int_to_ptr.vmem [resolvable:$true] %s15_s10 }
   0x3   :  { %18 = dma.hbm_to_vmem [thread:$0]  %s14_s8, 256, %s16_s10, [#allocation3]  }
   0x4   :  { %114 = dma.done.wait [#allocation3], 256  }
   0x5   :  { %115 = vsyncadd [#allocation3], 4294967040  ;;  %v119_v0 = vmov 6.0   ;;  %v23_v2 = vld [vmem:[#allocation2] sm:$0xff]  ;;  %v24_v3 = vld [vmem:[#allocation2 + $0x8] sm:$0xff]  ;;  %s120_s0 = smov [#allocation5]  }
   0x6   :  { %64 = vrcp.f32 %v119_v0  ;;  %v25_v4 = vadd.f32 3.0, %v23_v2  ;;  %v26_v6 = vadd.f32 3.0, %v24_v3  ;;  %s49_s11 = sshll.u32 %s120_s0, 4  ;;  %s51_s14 = sshll.u32 %s138_s1, 4  ;;  %s50_s11 = int_to_ptr.vmem [resolvable:$true] %s49_s11  ;;  %s52_s14 = int_to_ptr.hbm [resolvable:$true] %s51_s14 }
   0x8   :  { %v27_v7 = vmax.f32 %v25_v4, 0.0  ;;  %v28_v9 = vmax.f32 %v26_v6, 0.0 }
   0xa   :  { %v29_v11 = vmin.f32 %v27_v7, 6.0  ;;  %v30_v12 = vmin.f32 %v28_v9, 6.0 }
   0xc   :  { %v65_v1 = vpop.eup %64 }
   0xd   :  { %v32_v5 = vmul.f32 6.0, %v65_v1  ;;  %vm36_vm0 = vweird.f32 %v65_v1 }
   0xf   :  { %v33_v8 = vsub.f32 1.0, %v32_v5 }
  0x11   :  { %v34_v10 = vmul.f32 %v65_v1, %v33_v8 }
  0x13   :  { %v35_v13 = vadd.f32 %v65_v1, %v34_v10 }
  0x15   :  { %v37_v14 = vsel %vm36_vm0, %v65_v1, %v35_v13 }
  0x16   :  { %v38_v15 = vmul.f32 %v37_v14, %v29_v11  ;;  %v39_v16 = vmul.f32 %v37_v14, %v30_v12 }
  0x18   :  { %v40_v17 = vmul.f32 %v38_v15, %v23_v2  ;;  %v41_v18 = vmul.f32 %v39_v16, %v24_v3 }
  0x1a   :  { %42 = vst [vmem:[#allocation5] sm:$0xff] %v40_v17 }
  0x1b   :  { %43 = vst [vmem:[#allocation5 + $0x8] sm:$0xff] %v41_v18 }
  0x1c   :  { %54 = dma.vmem_to_hbm [thread:$0]  %s50_s11, 256, %s52_s14, [#allocation4]  }
  0x1d   :  { %116 = dma.done.wait [#allocation4], 256  }
  0x1e   :  { %117 = vsyncadd [#allocation4], 4294967040 }
  0x1f   :  { %59 = vsyncpa [#allocation3], 1 }
  0x20   :  { %60 = vsyncpa [#allocation4], 1 }

</bundles_post_ra>
